<compile_context>
chip_gen: v6e
topology: v6e:2x2x1
jax: 0.10.0
libtpu: 0.0.40
codegen_flags: <defaults>
</compile_context>

<pallas_src>
import functools
import math

import numpy as np
import jax
import jax.numpy as jnp
from jax.experimental import pallas as pl
from jax.experimental.pallas import tpu as pltpu


def _round_up(x, m):
    return ((x + m - 1) // m) * m


# ---------------------------------------------------------------------------
# Kernels
# ---------------------------------------------------------------------------

def _mlp12(x, w1_ref, b1_ref, w2_ref, b2_ref):
    """relu(relu(x@w1+b1)@w2+b2). bf16 MXU operands, f32 accumulation/epilogue."""
    h1 = jnp.dot(x.astype(jnp.bfloat16), w1_ref[...],
                 preferred_element_type=jnp.float32) + b1_ref[...]
    h1 = jnp.maximum(h1, 0.0)
    h2 = jnp.dot(h1.astype(jnp.bfloat16), w2_ref[...],
                 preferred_element_type=jnp.float32) + b2_ref[...]
    return jnp.maximum(h2, 0.0)


def _reduce_kernel(nvalid_ref, x_ref, w1_ref, b1_ref, w2_ref, b2_ref,
                   gmax_ref, *, tile_n):
    """Masked running max of h2 over valid rows, accumulated per part into (1,128) f32."""
    part = pl.program_id(0)
    i = pl.program_id(1)

    @pl.when(i == 0)
    def _():
        gmax_ref[...] = jnp.full(gmax_ref.shape, -jnp.inf, dtype=gmax_ref.dtype)

    h2 = _mlp12(x_ref[...], w1_ref, b1_ref, w2_ref, b2_ref)          # (tile_n, 128) f32
    row = i * tile_n + jax.lax.broadcasted_iota(jnp.int32, h2.shape, 0)
    h2 = jnp.where(row < nvalid_ref[part], h2, -jnp.inf)             # mask padded rows
    gmax_ref[...] = jnp.maximum(gmax_ref[...], jnp.max(h2, axis=0, keepdims=True))


def _enc_head_kernel(x_ref, w1_ref, b1_ref, w2_ref, b2_ref, w3a_ref, hb_ref, o_ref):
    """Encoder head: emb = h2 @ w3a + head_bias (gmax/b3/lan already folded into hb)."""
    h2 = _mlp12(x_ref[...], w1_ref, b1_ref, w2_ref, b2_ref)
    emb = jnp.dot(h2.astype(jnp.bfloat16), w3a_ref[...],
                  preferred_element_type=jnp.float32) + hb_ref[...]
    o_ref[...] = emb.astype(o_ref.dtype)


def _main_head_kernel(x_ref, w1_ref, b1_ref, w2_ref, b2_ref, w3a_ref, b3_ref,
                      w4_ref, b4_ref, o_ref):
    """Main head: h3 = relu(h2@w3a + b3_eff); out = h3@w4 + b4 (gmax folded into b3_eff)."""
    h2 = _mlp12(x_ref[...], w1_ref, b1_ref, w2_ref, b2_ref)
    h3 = jnp.maximum(
        jnp.dot(h2.astype(jnp.bfloat16), w3a_ref[...],
                preferred_element_type=jnp.float32) + b3_ref[...], 0.0)
    o = jnp.dot(h3.astype(jnp.bfloat16), w4_ref[...],
                preferred_element_type=jnp.float32) + b4_ref[...]
    o_ref[...] = o.astype(o_ref.dtype)


# ---------------------------------------------------------------------------
# pallas_call wrappers
# ---------------------------------------------------------------------------

def _compiler_params(sem, tn):
    # Double-buffered (tn,128) bf16/f32 streaming blocks stay far under the default
    # scoped-VMEM limit for tn <= 4096; only raise the limit for very large tiles.
    vmem = 48 * 1024 * 1024 if tn >= 4096 else None
    return pltpu.CompilerParams(dimension_semantics=sem, vmem_limit_bytes=vmem)


def _wspec(arr, with_prefetch):
    """Weight/bias BlockSpec: full-array block, indexed by part if stacked (lead>1)."""
    lead = arr.shape[0]
    if with_prefetch:
        idx = (lambda p, i, nv: (p, 0, 0)) if lead > 1 else (lambda p, i, nv: (0, 0, 0))
    else:
        idx = (lambda p, i: (p, 0, 0)) if lead > 1 else (lambda p, i: (0, 0, 0))
    return pl.BlockSpec((None,) + tuple(arr.shape[1:]), idx)


def tower_reduce(x, nvalid, w1, b1, w2, b2, *, tn):
    """Pass A: per-part masked global max of h2.  x: (P, n_pad, Cin).  Returns (P,1,128) f32."""
    nparts, n_pad, cin = x.shape
    return pl.pallas_call(
        functools.partial(_reduce_kernel, tile_n=tn),
        out_shape=jax.ShapeDtypeStruct((nparts, 1, 128), jnp.float32),
        grid_spec=pltpu.PrefetchScalarGridSpec(
            num_scalar_prefetch=1,                      # nvalid (per-part row counts) -> SMEM
            grid=(nparts, n_pad // tn),
            in_specs=[
                pl.BlockSpec((None, tn, cin), lambda p, i, nv: (p, i, 0)),
                _wspec(w1, True), _wspec(b1, True),
                _wspec(w2, True), _wspec(b2, True),
            ],
            # accumulator: output block index constant across the (arbitrary) tile axis
            out_specs=pl.BlockSpec((None, 1, 128), lambda p, i, nv: (p, 0, 0)),
        ),
        compiler_params=_compiler_params(("parallel", "arbitrary"), tn),
    )(nvalid, x, w1, b1, w2, b2)


def encoder_heads(x, w1, b1, w2, b2, w3a, head_bias, *, tn):
    """Pass B (encoder): per-point embedding slab.  Output (P, n_pad, 128) bf16."""
    nparts, n_pad, cin = x.shape
    return pl.pallas_call(
        _enc_head_kernel,
        out_shape=jax.ShapeDtypeStruct((nparts, n_pad, 128), jnp.bfloat16),
        grid_spec=pltpu.PrefetchScalarGridSpec(
            num_scalar_prefetch=0,
            grid=(nparts, n_pad // tn),
            in_specs=[
                pl.BlockSpec((None, tn, cin), lambda p, i: (p, i, 0)),
                _wspec(w1, False), _wspec(b1, False),
                _wspec(w2, False), _wspec(b2, False),
                _wspec(w3a, False), _wspec(head_bias, False),
            ],
            out_specs=pl.BlockSpec((None, tn, 128), lambda p, i: (p, i, 0)),
        ),
        compiler_params=_compiler_params(("parallel", "parallel"), tn),
    )(x, w1, b1, w2, b2, w3a, head_bias)


def main_heads(x, w1, b1, w2, b2, w3a, b3, w4, b4, *, tn):
    """Pass B (main net): per-point class logits slab.  Output (P, n_pad, 128) f32."""
    nparts, n_pad, cin = x.shape
    return pl.pallas_call(
        _main_head_kernel,
        out_shape=jax.ShapeDtypeStruct((nparts, n_pad, 128), jnp.float32),
        grid_spec=pltpu.PrefetchScalarGridSpec(
            num_scalar_prefetch=0,
            grid=(nparts, n_pad // tn),
            in_specs=[
                pl.BlockSpec((None, tn, cin), lambda p, i: (p, i, 0)),
                _wspec(w1, False), _wspec(b1, False),
                _wspec(w2, False), _wspec(b2, False),
                _wspec(w3a, False), _wspec(b3, False),
                _wspec(w4, False), _wspec(b4, False),
            ],
            out_specs=pl.BlockSpec((None, tn, 128), lambda p, i: (p, i, 0)),
        ),
        compiler_params=_compiler_params(("parallel", "parallel"), tn),
    )(x, w1, b1, w2, b2, w3a, b3, w4, b4)


# ---------------------------------------------------------------------------
# Parameter init (deterministic, synthetic; matmul weights bf16, biases f32)
# ---------------------------------------------------------------------------

def _dense_init(key, cin, cout):
    kw, kb = jax.random.split(key)
    w = jax.random.normal(kw, (cin, cout), jnp.float32) * (1.0 / math.sqrt(cin))
    b = jax.random.normal(kb, (1, cout), jnp.float32) * 0.01
    return w, b


def _pad2(a, shape):
    return jnp.zeros(shape, a.dtype).at[:a.shape[0], :a.shape[1]].set(a)


def init_encoders(key, nparts=2):
    """pa_encoder (part 0) and pb_encoder (part 1), weights stacked along a leading axis."""
    w1s, b1s, w2s, b2s, w3as, w3bs, b3s = [], [], [], [], [], [], []
    for _ in range(nparts):
        k1, k2, k3, key = jax.random.split(key, 4)
        w1, b1 = _dense_init(k1, 3, 64)        # cin 3 -> padded to 8; cout padded to 128 lanes
        w2, b2 = _dense_init(k2, 64, 128)
        w3, b3 = _dense_init(k3, 256, 64)      # concat(h2, global_max) -> 64-ch embedding
        w1s.append(_pad2(w1, (8, 128)))
        b1s.append(_pad2(b1, (1, 128)))
        w2s.append(_pad2(w2, (128, 128)))
        b2s.append(b2)
        w3as.append(_pad2(w3[:128], (128, 128)))
        w3bs.append(_pad2(w3[128:], (128, 128)))
        b3s.append(_pad2(b3, (1, 128)))
    stack = lambda xs: jnp.stack(xs, axis=0)
    return {
        "w1": stack(w1s).astype(jnp.bfloat16),   # (2, 8, 128)
        "b1": stack(b1s),                        # (2, 1, 128) f32
        "w2": stack(w2s).astype(jnp.bfloat16),   # (2, 128, 128)
        "b2": stack(b2s),                        # (2, 1, 128) f32
        "w3a": stack(w3as).astype(jnp.bfloat16), # (2, 128, 128)
        "w3b": stack(w3bs),                      # (2, 128, 128) f32 (folded in wrapper)
        "b3": stack(b3s),                        # (2, 1, 128) f32 (folded in wrapper)
    }


def init_lan_proj(key):
    w, b = _dense_init(key, 512, 32)
    return {"w": w, "b": b}                      # folded into the encoder head bias


def init_main(key, num_classes=3, embed_dim=64):
    kt, k1, k1t, k2, k3, k4 = jax.random.split(key, 6)
    wt, bt = _dense_init(kt, embed_dim, embed_dim)     # time-embedding MLP (wrapper)
    w1, b1 = _dense_init(k1, 103, 128)                 # pdf(96) + point feats(7)
    w1t, _ = _dense_init(k1t, embed_dim, 128)          # time channels of layer 1 (bias fold)
    w2, b2 = _dense_init(k2, 128, 128)
    w3, b3 = _dense_init(k3, 256, 128)
    w4, b4 = _dense_init(k4, 128, num_classes)
    return {
        "wt": wt, "bt": bt, "w1t": w1t, "b1_base": b1,
        "w1": _pad2(w1, (128, 128)).astype(jnp.bfloat16)[None],  # (1, 128, 128)
        "w2": w2.astype(jnp.bfloat16)[None],
        "b2": b2[None],                                          # (1, 1, 128) f32
        "w3a": w3[:128].astype(jnp.bfloat16)[None],
        "w3b": w3[128:],                                         # (128, 128) f32 (wrapper fold)
        "b3": b3,                                                # (1, 128) f32 (wrapper fold)
        "w4": _pad2(w4, (128, 128)).astype(jnp.bfloat16)[None],
        "b4": _pad2(b4, (1, 128))[None],
    }


def init_pvcnn_params(key):
    k_lan, k_enc, k_main = jax.random.split(key, 3)
    return {
        "lan_proj": init_lan_proj(k_lan),
        "encoders": init_encoders(k_enc),   # PVCNNEn(num_classes=64) stand-ins, parts stacked
        "pvcnn": init_main(k_main, num_classes=3, embed_dim=64),
    }


# ---------------------------------------------------------------------------
# Forward (hot paths in Pallas; tiny constant/1-row folds in plain JAX)
# ---------------------------------------------------------------------------

def timestep_embedding(t, dim=64):
    half = dim // 2
    freqs = jnp.exp(-math.log(10000.0) * jnp.arange(half, dtype=jnp.float32) / half)
    t = jnp.reshape(jnp.asarray(t, jnp.float32), (1,))
    args = t[:, None] * freqs[None, :]
    return jnp.concatenate([jnp.sin(args), jnp.cos(args)], axis=-1)  # (1, dim)


def pvcnn_forward(params, x_input, p0, t, mask, lan_emd,
                  id=None, p0_encoder=None, p0_color=None, pdf=None,
                  use_color=False, tile_n=2048):
    """Mirror of PVCNN.forward.  mask is a host numpy array (static split indices)."""
    n = int(mask.shape[0])
    mask = np.asarray(mask)
    idx_a = np.where(mask == 0)[0]
    idx_b = np.where(mask == 1)[0]
    n_a, n_b = int(idx_a.shape[0]), int(idx_b.shape[0])
    perm = np.concatenate([idx_a, idx_b])
    inv_perm = np.empty_like(perm)
    inv_perm[perm] = np.arange(n)

    # part-padded layout shared by all kernels (32 covers f32/bf16 sublane tiling)
    n_max = max(n_a, n_b, 1)
    tn = min(tile_n, _round_up(n_max, 32))
    n_pad = _round_up(n_max, tn)
    nvalid = jnp.asarray([n_a, n_b], jnp.int32)

    if pdf is None:
        # TODO(synk): use_color / 6-channel encoder-input path not exercised (no source given).
        x_enc = jnp.zeros((2, n_pad, 8), jnp.float32)            # cin 3 -> padded to 8
        x_enc = x_enc.at[0, :n_a, :3].set(p0[idx_a].astype(jnp.float32))
        x_enc = x_enc.at[1, :n_b, :3].set(p0[idx_b].astype(jnp.float32))

        ep = params["encoders"]
        gmax_enc = tower_reduce(x_enc, nvalid, ep["w1"], ep["b1"], ep["w2"], ep["b2"], tn=tn)

        # fold lan_proj + global-max head contribution + b3 into one per-part bias (tiny, f32)
        lp = params["lan_proj"]
        lan32 = jnp.reshape(lan_emd.astype(jnp.float32), (1, 512)) @ lp["w"] + lp["b"]
        lan_pad = jnp.zeros((1, 1, 128), jnp.float32).at[0, 0, 64:96].set(lan32[0])
        head_bias = (jnp.einsum("pik,pkj->pij", gmax_enc, ep["w3b"])
                     + ep["b3"] + lan_pad)                        # (2, 1, 128)

        enc_slab = encoder_heads(x_enc, ep["w1"], ep["b1"], ep["w2"], ep["b2"],
                                 ep["w3a"], head_bias, tn=tn)     # (2, n_pad, 128) bf16
        pdf_parts = enc_slab                                      # cols 0:64 emb, 64:96 lan
        pdf_cat = jnp.concatenate([enc_slab[0, :n_a, :96], enc_slab[1, :n_b, :96]], axis=0)
        pdf = pdf_cat[inv_perm].astype(jnp.float32)               # (N, 96), original order
    else:
        pdf_f = jnp.asarray(pdf, jnp.float32)
        pdf_parts = jnp.zeros((2, n_pad, 128), jnp.bfloat16)
        pdf_parts = pdf_parts.at[0, :n_a, :96].set(pdf_f[idx_a].astype(jnp.bfloat16))
        pdf_parts = pdf_parts.at[1, :n_b, :96].set(pdf_f[idx_b].astype(jnp.bfloat16))

    # main-net input slab (bf16): cols 0:96 = pdf, 96:103 = x_input (small-tensor gather only)
    xin = pdf_parts.at[0, :n_a, 96:103].set(x_input[idx_a].astype(jnp.bfloat16))
    xin = xin.at[1, :n_b, 96:103].set(x_input[idx_b].astype(jnp.bfloat16))

    mp = params["pvcnn"]
    # time-embedding MLP + fold of layer-1's time channels into its bias (constant over points)
    temb = timestep_embedding(t, 64)
    temb = jnp.maximum(temb @ mp["wt"] + mp["bt"], 0.0)                     # (1, 64)
    b1_eff = (mp["b1_base"] + temb @ mp["w1t"]).reshape(1, 1, 128)

    # pass A: per-part partial max; combine + fold gmax@w3b into layer-3 bias (tiny, f32)
    gmax_parts = tower_reduce(xin, nvalid, mp["w1"], b1_eff, mp["w2"], mp["b2"], tn=tn)
    gmax = jnp.max(gmax_parts, axis=0)                                      # (1, 128)
    b3_eff = (gmax @ mp["w3b"] + mp["b3"]).reshape(1, 1, 128)

    # pass B: heads, fully parallel grid
    out_slab = main_heads(xin, mp["w1"], b1_eff, mp["w2"], mp["b2"],
                          mp["w3a"], b3_eff, mp["w4"], mp["b4"], tn=tn)     # (2, n_pad, 128)
    out_cat = jnp.concatenate([out_slab[0, :n_a, :3], out_slab[1, :n_b, :3]], axis=0)
    out = out_cat[inv_perm]                                                 # (N, 3)
    # dropout=0.1 is an eval-time no-op (omitted).
    return out, pdf


# ---------------------------------------------------------------------------
# Main
# ---------------------------------------------------------------------------

if __name__ == "__main__":
    key = jax.random.PRNGKey(0)
    k_par, k_x, k_p, k_lan = jax.random.split(key, 4)

    N = 128                        # number of points (len(mask))
    params = init_pvcnn_params(k_par)

    x_input = jax.random.normal(k_x, (N, 7), jnp.float32)    # input_dim = 3 + 3 + 1
    p0 = jax.random.normal(k_p, (N, 3), jnp.float32)         # point coordinates
    t = jnp.float32(12.0)                                     # diffusion timestep
    mask = (np.arange(N) % 2).astype(np.int32)                # half part-A, half part-B
    lan_emd = jax.random.normal(k_lan, (1, 512), jnp.float32)

    out, pdf = pvcnn_forward(params, x_input, p0, t, mask, lan_emd)
    out = jax.block_until_ready(out)
    pdf = jax.block_until_ready(pdf)

    assert out.shape == (N, 3), out.shape
    assert pdf.shape == (N, 96), pdf.shape
    assert np.isfinite(np.asarray(out)).all()
    assert np.isfinite(np.asarray(pdf)).all()
    print("KERNEL_OK")
</pallas_src>

<mosaic_0001>
module attributes {stable_mosaic.version = 11 : i64} {
  func.func @_reduce_kernel(%arg0: i32, %arg1: i32, %arg2: memref<2xi32, #tpu.memory_space<smem>>, %arg3: memref<1x64x8xf32, #tpu.memory_space<vmem>>, %arg4: memref<1x8x128xbf16, #tpu.memory_space<vmem>>, %arg5: memref<1x1x128xf32, #tpu.memory_space<vmem>>, %arg6: memref<1x128x128xbf16, #tpu.memory_space<vmem>>, %arg7: memref<1x1x128xf32, #tpu.memory_space<vmem>>, %arg8: memref<1x1x128xf32, #tpu.memory_space<vmem>>) attributes {dimension_semantics = [#tpu.dimension_semantics<parallel>, #tpu.dimension_semantics<arbitrary>], iteration_bounds = array<i64: 2, 1>, scalar_prefetch = 1 : i64, scratch_operands = 0 : i64, tpu.core_type = #tpu.core_type<tc>, window_params = [{transform_indices = @transform_0, window_bounds = array<i64: 1, 64, 8>}, {transform_indices = @transform_1, window_bounds = array<i64: 1, 8, 128>}, {transform_indices = @transform_2, window_bounds = array<i64: 1, 1, 128>}, {transform_indices = @transform_3, window_bounds = array<i64: 1, 128, 128>}, {transform_indices = @transform_4, window_bounds = array<i64: 1, 1, 128>}, {transform_indices = @transform_5, window_bounds = array<i64: 1, 1, 128>}]} {
    %c0_i32 = arith.constant 0 : i32
    %0 = arith.cmpi eq, %arg1, %c0_i32 : i32
    %1 = arith.extui %0 : i1 to i32
    %c0_i32_0 = arith.constant 0 : i32
    %2 = arith.cmpi ne, %1, %c0_i32_0 : i32
    scf.if %2 {
      %cst_26 = arith.constant 0xFF800000 : f32
      %43 = vector.broadcast %cst_26 : f32 to vector<1x128xf32>
      %c0_27 = arith.constant 0 : index
      %c0_28 = arith.constant 0 : index
      %c0_29 = arith.constant 0 : index
      %44 = vector.load %arg8[%c0_27, %c0_28, %c0_29] : memref<1x1x128xf32, #tpu.memory_space<vmem>>, vector<1x1x128xf32>
      %45 = vector.shape_cast %44 : vector<1x1x128xf32> to vector<1x128xf32>
      %46 = vector.shape_cast %43 : vector<1x128xf32> to vector<1x1x128xf32>
      tpu.vector_store %arg8[%c0_27, %c0_28, %c0_29], %46 {strides = array<i32>} : memref<1x1x128xf32, #tpu.memory_space<vmem>>, vector<1x1x128xf32>,
    } else {
    }
    %c0 = arith.constant 0 : index
    %c0_1 = arith.constant 0 : index
    %c0_2 = arith.constant 0 : index
    %3 = vector.load %arg3[%c0, %c0_1, %c0_2] : memref<1x64x8xf32, #tpu.memory_space<vmem>>, vector<1x64x8xf32>
    %4 = vector.shape_cast %3 : vector<1x64x8xf32> to vector<64x8xf32>
    %5 = arith.truncf %4 : vector<64x8xf32> to vector<64x8xbf16>
    %c0_3 = arith.constant 0 : index
    %c0_4 = arith.constant 0 : index
    %c0_5 = arith.constant 0 : index
    %6 = vector.load %arg4[%c0_3, %c0_4, %c0_5] : memref<1x8x128xbf16, #tpu.memory_space<vmem>>, vector<1x8x128xbf16>
    %7 = vector.shape_cast %6 : vector<1x8x128xbf16> to vector<8x128xbf16>
    %cst = arith.constant dense<0.000000e+00> : vector<64x128xf32>
    %8 = tpu.matmul %5, %7, %cst {dimension_numbers = #tpu.dot_dimension_numbers<[1], [0], [0], [1], [0, 0, 1, 1], [], []>} : vector<64x8xbf16>, vector<8x128xbf16>, vector<64x128xf32> -> vector<64x128xf32>
    %c0_6 = arith.constant 0 : index
    %c0_7 = arith.constant 0 : index
    %c0_8 = arith.constant 0 : index
    %9 = vector.load %arg5[%c0_6, %c0_7, %c0_8] : memref<1x1x128xf32, #tpu.memory_space<vmem>>, vector<1x1x128xf32>
    %10 = vector.shape_cast %9 : vector<1x1x128xf32> to vector<1x128xf32>
    %11 = vector.broadcast %10 : vector<1x128xf32> to vector<64x128xf32>
    %12 = arith.addf %8, %11 : vector<64x128xf32>
    %cst_9 = arith.constant 0.000000e+00 : f32
    %13 = vector.broadcast %cst_9 : f32 to vector<64x128xf32>
    %14 = arith.maximumf %12, %13 : vector<64x128xf32>
    %15 = arith.truncf %14 : vector<64x128xf32> to vector<64x128xbf16>
    %c0_10 = arith.constant 0 : index
    %c0_11 = arith.constant 0 : index
    %c0_12 = arith.constant 0 : index
    %16 = vector.load %arg6[%c0_10, %c0_11, %c0_12] : memref<1x128x128xbf16, #tpu.memory_space<vmem>>, vector<1x128x128xbf16>
    %17 = vector.shape_cast %16 : vector<1x128x128xbf16> to vector<128x128xbf16>
    %cst_13 = arith.constant dense<0.000000e+00> : vector<64x128xf32>
    %18 = tpu.matmul %15, %17, %cst_13 {dimension_numbers = #tpu.dot_dimension_numbers<[1], [0], [0], [1], [0, 0, 1, 1], [], []>} : vector<64x128xbf16>, vector<128x128xbf16>, vector<64x128xf32> -> vector<64x128xf32>
    %c0_14 = arith.constant 0 : index
    %c0_15 = arith.constant 0 : index
    %c0_16 = arith.constant 0 : index
    %19 = vector.load %arg7[%c0_14, %c0_15, %c0_16] : memref<1x1x128xf32, #tpu.memory_space<vmem>>, vector<1x1x128xf32>
    %20 = vector.shape_cast %19 : vector<1x1x128xf32> to vector<1x128xf32>
    %21 = vector.broadcast %20 : vector<1x128xf32> to vector<64x128xf32>
    %22 = arith.addf %18, %21 : vector<64x128xf32>
    %cst_17 = arith.constant 0.000000e+00 : f32
    %23 = vector.broadcast %cst_17 : f32 to vector<64x128xf32>
    %24 = arith.maximumf %22, %23 : vector<64x128xf32>
    %c64_i32 = arith.constant 64 : i32
    %25 = arith.muli %arg1, %c64_i32 : i32
    %26 = tpu.iota {dimensions = array<i32: 0>} : vector<64x128xi32>
    %27 = vector.broadcast %25 : i32 to vector<64x128xi32>
    %28 = arith.addi %27, %26 : vector<64x128xi32>
    %29 = arith.index_cast %arg0 : i32 to index
    %30 = memref.load %arg2[%29] : memref<2xi32, #tpu.memory_space<smem>>
    %31 = vector.broadcast %30 : i32 to vector<64x128xi32>
    %32 = arith.cmpi slt, %28, %31 : vector<64x128xi32>
    %cst_18 = arith.constant 0xFF800000 : f32
    %33 = vector.broadcast %cst_18 : f32 to vector<64x128xf32>
    %34 = arith.select %32, %24, %33 : vector<64x128xi1>, vector<64x128xf32>
    %c0_19 = arith.constant 0 : index
    %c0_20 = arith.constant 0 : index
    %c0_21 = arith.constant 0 : index
    %35 = vector.load %arg8[%c0_19, %c0_20, %c0_21] : memref<1x1x128xf32, #tpu.memory_space<vmem>>, vector<1x1x128xf32>
    %36 = vector.shape_cast %35 : vector<1x1x128xf32> to vector<1x128xf32>
    %cst_22 = arith.constant dense<0xFF800000> : vector<128xf32>
    %37 = vector.multi_reduction <maximumf>, %34, %cst_22 [0] : vector<64x128xf32> to vector<128xf32>
    %38 = vector.shape_cast %37 : vector<128xf32> to vector<1x128xf32>
    %39 = arith.maximumf %36, %38 : vector<1x128xf32>
    %c0_23 = arith.constant 0 : index
    %c0_24 = arith.constant 0 : index
    %c0_25 = arith.constant 0 : index
    %40 = vector.load %arg8[%c0_23, %c0_24, %c0_25] : memref<1x1x128xf32, #tpu.memory_space<vmem>>, vector<1x1x128xf32>
    %41 = vector.shape_cast %40 : vector<1x1x128xf32> to vector<1x128xf32>
    %42 = vector.shape_cast %39 : vector<1x128xf32> to vector<1x1x128xf32>
    tpu.vector_store %arg8[%c0_23, %c0_24, %c0_25], %42 {strides = array<i32>} : memref<1x1x128xf32, #tpu.memory_space<vmem>>, vector<1x1x128xf32>,
    return
  }
  func.func @transform_0(%arg0: i32, %arg1: i32, %arg2: memref<2xi32, #tpu.memory_space<smem>>) -> (i32, i32, i32) {
    %c0_i32 = arith.constant 0 : i32
    %c0_i32_0 = arith.constant 0 : i32
    return %arg0, %arg1, %c0_i32 : i32, i32, i32
  }
  func.func @transform_1(%arg0: i32, %arg1: i32, %arg2: memref<2xi32, #tpu.memory_space<smem>>) -> (i32, i32, i32) {
    %c0_i32 = arith.constant 0 : i32
    %c0_i32_0 = arith.constant 0 : i32
    %c0_i32_1 = arith.constant 0 : i32
    return %arg0, %c0_i32, %c0_i32_0 : i32, i32, i32
  }
  func.func @transform_2(%arg0: i32, %arg1: i32, %arg2: memref<2xi32, #tpu.memory_space<smem>>) -> (i32, i32, i32) {
    %c0_i32 = arith.constant 0 : i32
    %c0_i32_0 = arith.constant 0 : i32
    %c0_i32_1 = arith.constant 0 : i32
    return %arg0, %c0_i32, %c0_i32_0 : i32, i32, i32
  }
  func.func @transform_3(%arg0: i32, %arg1: i32, %arg2: memref<2xi32, #tpu.memory_space<smem>>) -> (i32, i32, i32) {
    %c0_i32 = arith.constant 0 : i32
    %c0_i32_0 = arith.constant 0 : i32
    %c0_i32_1 = arith.constant 0 : i32
    return %arg0, %c0_i32, %c0_i32_0 : i32, i32, i32
  }
  func.func @transform_4(%arg0: i32, %arg1: i32, %arg2: memref<2xi32, #tpu.memory_space<smem>>) -> (i32, i32, i32) {
    %c0_i32 = arith.constant 0 : i32
    %c0_i32_0 = arith.constant 0 : i32
    %c0_i32_1 = arith.constant 0 : i32
    return %arg0, %c0_i32, %c0_i32_0 : i32, i32, i32
  }
  func.func @transform_5(%arg0: i32, %arg1: i32, %arg2: memref<2xi32, #tpu.memory_space<smem>>) -> (i32, i32, i32) {
    %c0_i32 = arith.constant 0 : i32
    %c0_i32_0 = arith.constant 0 : i32
    %c0_i32_1 = arith.constant 0 : i32
    return %arg0, %c0_i32, %c0_i32_0 : i32, i32, i32
  }
}

</mosaic_0001>

<bundles_post_ra>
// kernel: tpu_custom_call.1
= control target key start
LH: loop header
LB: loop body
LE: loop exit
PB: predicated region body
PF: predicated region fallthrough
CT: control target
= control target key end

     0   :  { %s1201_s0 = inlined_call_operand.vmem [shape: s32[2], index: 0, kind: input, shape index: {}]   ;;  %s1202_s1 = inlined_call_operand.vmem [shape: f32[2,64,8], index: 1, kind: input, shape index: {}]   ;;  %s1203_s2 = inlined_call_operand.vmem [shape: bf16[2,8,128], index: 2, kind: input, shape index: {}]   ;;  %s1204_s3 = inlined_call_operand.vmem [shape: f32[2,1,128], index: 3, kind: input, shape index: {}]   ;;  %s1205_s4 = inlined_call_operand.vmem [shape: bf16[2,128,128], index: 4, kind: input, shape index: {}]   ;;  %s1206_s5 = inlined_call_operand.vmem [shape: f32[2,1,128], index: 5, kind: input, shape index: {}]   ;;  %s1207_s6 = inlined_call_operand.hbm [shape: f32[2,1,128], index: 6, kind: output, shape index: {}]  }
   0x1   :  { %s11_s23 = sshll.u32 %s1201_s0, 4  ;;  %s12_s23 = int_to_ptr.vmem [resolvable:$true] %s11_s23 }
   0x2   :  { %s925_s24 = scalar_lea.vmem %s12_s23, 16  ;;  %p930_p1 = scmp.lt.s32.totalorder %s12_s23, %s12_s23 }
   0x3   :  { %p926_p0 = scmp.ne.s32.totalorder %s12_s23, %s925_s24  ;;  %p931_p2 = scmp.lt.s32.totalorder %s925_s24, %s925_s24 }
   0x5   :  { %p932_p3 = por %p931_p2, %p930_p1 }
   0x7   :  { %p933_p4 = pnand %p932_p3, %p926_p0 }
   0x9   :  { %936 = shalt.err (!%p933_p4)  }
   0xa   :  { %s1017_s25 = smov [#allocation3]  }
   0xb   :  { %14 = dma.vmem_to_smem %s12_s23, 16, %s1017_s25, [#allocation2] }
   0xc   :  { %987 = dma.done.wait [#allocation2], 16 }
   0xd   :  { %988 = vsyncadd [#allocation2], 4294967280 }
   0xe   :  { %16 = sfence }
   0xf   :  { %17 = vsyncpa [#allocation5], 0 }
  0x10   :  { %19 = vsyncpa [#allocation5 + $0x1], 0  ;;  %s1058_s26 = smov 0   ;;  %s1060_s27 = smov 0  }
  0x11   :  { %s1062_s0 = smov 0   ;;  %s1064_s28 = smov 0  }
  0x12   :  { %s1066_s29 = smov 0   ;;  %s1068_s30 = smov 0  }
  0x13 LB: > { %s763_s7 = sadd.s32 4294967295, %s1015_s30   ;;  %s764_s8 = sadd.s32 4294967294, %s1015_s30   ;;  %s1015_s30 = sphi %s1068_s30, %s25_s30   ;;  %s1011_s29 = sphi %s1066_s29, %s1214_s29   ;;  %s1007_s28 = sphi %s1064_s28, %s1213_s28   ;;  %s1003_s0 = sphi %s1062_s0, %s1212_s0   ;;  %s999_s27 = sphi %s1060_s27, %s1211_s27   ;;  %s995_s26 = sphi %s1058_s26, %s1210_s26  }
  0x14   : > { %s37_s9 = sadd.s32 1, %s1011_s29  ;;  %s176_s10 = sadd.s32 1, %s1003_s0 }
  0x15   : > { %p39_p5 = scmp.ge.s32.totalorder %s37_s9, 2  ;;  %p186_p6 = scmp.ne.s32.totalorder %s1003_s0, %s999_s27 }
  0x16   : > { %p187_p7 = scmp.eq.s32.totalorder %s763_s7, 1  ;;  %p192_p8 = scmp.ne.s32.totalorder %s999_s27, %s995_s26 }
  0x17   : > { %s1216_s9 = smov (%p39_p5, %s37_s9), 0  ;;  %p193_p10 = scmp.eq.s32.totalorder %s764_s8, 1 }
  0x18   : > { %p1098_p9 = por %p187_p7, %p186_p6  ;;  %s173_s12 = ssub.s32 %s1011_s29, %s1216_s9 }
  0x19   : > { %p767_p11 = scmp.ge.s32.totalorder %s1015_s30, 1  ;;  %p174_p12 = scmp.eq.s32.totalorder %s173_s12, 0 }
  0x1a   : > { %p1105_p13 = por %p193_p10, %p192_p8  ;;  %p251_p0 = scmp.lt.s32.totalorder %s1015_s30, 3 }
  0x1b   : > { %s1111_s14 = scalar_select %p174_p12, %s1003_s0, %s176_s10  }
  0x1c   : > { %p252_p1 = pnand %p767_p11, %p251_p0 }
  0x1d   : > { %p298_p2 = scmp.lt.s32.totalorder (!%p252_p1), %s1007_s28, 1  ;;  %s605_s18 = sld [smem:[#allocation3 + %s1007_s28]] (!%p252_p1) }
  0x1e   : > { %255 = sbr.rel (%p252_p1) target bundleno = 495 (0x1ef), region = 40  ;;  %s1019_s10 = smov (!%p252_p1), [#allocation4]  }
  0x23   : > { %s1115_s15 = scalar_select %p298_p2, %s1007_s28, 1  ;;  %vm361_vm0 = vcmask 1043456   ;;  %vm348_vm1 = vcmask 64512   ;;  %v1018_v51 = vmov -inf   ;;  %v587_v53 = vlaneseq }
  0x24   : > { %v606_v62 = vstv %s605_s18 }
  0x25   : > { %s790_s16 = sshll.u32 %s1115_s15, 6  ;;  %s770_s17 = sshll.u32 %s1115_s15, 2  ;;  %v588_v55 = vshrl.u32 %v587_v53, 7 }
  0x26   : > { %s305_s20 = scalar_lea.vmem %s1202_s1, %s790_s16  ;;  %s310_s23 = scalar_lea.vmem %s1203_s2, %s770_s17 }
  0x27   : > { %s1128_s7 = scalar_lea.vmem %s1205_s4, %s790_s16  ;;  %v340_v0 = vld [vmem:[%s310_s23] sm:$0xf]  ;;  %v329_v2 = vld [vmem:[%s305_s20 + $0x8] sm:$0xff]  ;;  %v330_v5 = vld [vmem:[%s305_s20 + $0x10] sm:$0xff]  ;;  %s313_s12 = scalar_lea.vmem %s1204_s3, %s1115_s15  ;;  %v590_v58 = vadd.s32 16, %v588_v55  ;;  %v591_v63 = vadd.s32 24, %v588_v55  ;;  %vm607_vm7 = vcmp.lt.s32.totalorder %v588_v55, %v606_v62 }
  0x28   : > { %v328_v1 = vld [vmem:[%s305_s20] sm:$0xff]  ;;  %859 = vmatprep.subr.msk.bf16.mxu0 %vm361_vm0, %v340_v0  ;;  %v363_v3 = vsel %vm361_vm0, %v340_v0, 0  ;;  %v331_v6 = vld [vmem:[%s305_s20 + $0x18] sm:$0xff]  ;;  %v333_v9 = vld [vmem:[%s305_s20 + $0x28] sm:$0xff]  ;;  %s295_s16 = sand.u32 1, %s999_s27   ;;  %s321_s21 = scalar_lea.vmem %s1206_s5, %s1115_s15 }
  0x29   : > { %v336_v4 = vpack.c.bf16 %v329_v2, %v328_v1  ;;  %v332_v7 = vld [vmem:[%s305_s20 + $0x20] sm:$0xff]  ;;  %810 = vmatpush3.bf16.msra.mxu0 %v363_v3  ;;  %v337_v8 = vpack.c.bf16 %v331_v6, %v330_v5  ;;  %v917_v11 = vld [vmem:[%s1128_s7 + $0x38] sm:$0xff]   ;;  %v918_v12 = vld [vmem:[%s1128_s7 + $0x30] sm:$0xff]   ;;  %s1149_s17 = scalar_lea.vmem [#allocation4], %s295_s16  ;;  %v594_v2 = vadd.s32 48, %v588_v55  ;;  %v595_v5 = vadd.s32 56, %v588_v55 }
  0x2a   : > { %v338_v10 = vpack.c.bf16 %v333_v9, %v332_v7  ;;  %v334_v13 = vld [vmem:[%s305_s20 + $0x30] sm:$0xff]  ;;  %819 = vmatprep.subr.bf16.mxu0 %v917_v11  ;;  %v335_v14 = vld [vmem:[%s305_s20 + $0x38] sm:$0xff]  ;;  %843 = vmatprep.subr.bf16.mxu1 %v917_v11  ;;  %v919_v15 = vld [vmem:[%s1128_s7 + $0x28] sm:$0xff]   ;;  %327 = vst [vmem:[%s1149_s17] sm:$0x1] %v1018_v51  ;;  %vm609_vm2 = vcmp.lt.s32.totalorder %v590_v58, %v606_v62  ;;  %s787_s15 = sshll.u32 %s1007_s28, 4  ;;  %s652_s22 = sshll.u32 %s1149_s17, 4  ;;  %s653_s22 = int_to_ptr.vmem [resolvable:$true] %s652_s22 }
  0x2b   : > { %811 = vmatprep.mubr.msk.bf16.mxu0 %vm348_vm1, %v336_v4  ;;  %851 = vmatpush3.bf16.msra.mxu1 %v917_v11  ;;  %v339_v16 = vpack.c.bf16 %v335_v14, %v334_v13  ;;  %v920_v17 = vld [vmem:[%s1128_s7 + $0x20] sm:$0xff]   ;;  %v921_v18 = vld [vmem:[%s1128_s7 + $0x18] sm:$0xff]   ;;  %v922_v19 = vld [vmem:[%s1128_s7 + $0x10] sm:$0xff]   ;;  %v592_v4 = vadd.s32 32, %v588_v55  ;;  %vm610_vm3 = vcmp.lt.s32.totalorder %v591_v63, %v606_v62  ;;  %vm613_vm4 = vcmp.lt.s32.totalorder %v594_v2, %v606_v62  ;;  %s650_s25 = scalar_lea.hbm %s1207_s6, %s787_s15  ;;  %s937_s8 = scalar_lea.vmem %s653_s22, 16 }
  0x2c   : > { %812 = vmatmul.mubr.msk.bf16.vlgmr.msra.gmra.mxu0 %vm348_vm1, %v337_v8  ;;  %844 = vmatprep.subr.bf16.mxu1 %v918_v12  ;;  %v923_v20 = vld [vmem:[%s1128_s7 + $0x8] sm:$0xff]   ;;  %v924_v21 = vld [vmem:[%s1128_s7] sm:$0xff]   ;;  %vm614_vm6 = vcmp.lt.s32.totalorder %v595_v5, %v606_v62  ;;  %s640_s7 = scalar_lea.sflag [#allocation5], %s295_s16  ;;  %p938_p3 = scmp.ne.s32.totalorder %s653_s22, %s937_s8 }
  0x2d   : > { %815 = vmatprep.mubr.msk.bf16.mxu0 %vm348_vm1, %v338_v10  ;;  %820 = vmatpush3.bf16.msra.mxu0 %v917_v11  ;;  %v773_v24 = vld [vmem:[%s313_s12] ss:$0 sm:$0xff]  ;;  %v589_v10 = vadd.s32 8, %v588_v55  ;;  %vm611_vm5 = vcmp.lt.s32.totalorder %v592_v4, %v606_v62  ;;  %s941_s12 = sshll.u32 %s1019_s10, 4  ;;  %s942_s12 = int_to_ptr.vmem [resolvable:$false] %s941_s12 }
  0x2e   : > { %821 = vmatprep.subr.bf16.mxu0 %v918_v12  ;;  %v778_v57 = vld [vmem:[%s321_s21] ss:$0 sm:$0xff]  ;;  %p939_p4 = pnand %p938_p3, %p1098_p9  ;;  %s943_s28 = scalar_lea.vmem %s942_s12, 32 }
  0x2f   : > { %852 = vmatpush3.bf16.msra.mxu1 %v918_v12  ;;  %vm608_vm8 = vcmp.lt.s32.totalorder %v589_v10, %v606_v62  ;;  %p944_p6 = scmp.lt.s32.totalorder %s653_s22, %s942_s12  ;;  %p945_p7 = scmp.lt.s32.totalorder %s943_s28, %s937_s8 }
  0x30   : > { %845 = vmatprep.subr.bf16.mxu1 %v919_v15  ;;  %p940_p5 = pneg %p939_p4 }
  0x31   : > { %822 = vmatpush3.bf16.msra.mxu0 %v918_v12  ;;  %v593_v12 = vadd.s32 40, %v588_v55  ;;  %p946_p8 = por %p945_p7, %p944_p6 }
  0x32   : > { %823 = vmatprep.subr.bf16.mxu0 %v919_v15 }
  0x33   : > { %853 = vmatpush3.bf16.msra.mxu1 %v919_v15  ;;  %vm612_vm9 = vcmp.lt.s32.totalorder %v593_v12, %v606_v62  ;;  %p947_p10 = pnand %p946_p8, %p940_p5 }
  0x34   : > { %816 = vmatmul.mubr.msk.bf16.gmra.mxu0 %vm348_vm1, %v339_v16  ;;  %846 = vmatprep.subr.bf16.mxu1 %v920_v17 }
  0x35   : > { %824 = vmatpush3.bf16.msra.mxu0 %v919_v15 }
  0x36   : > { %825 = vmatprep.subr.bf16.mxu0 %v920_v17 }
  0x37   : > { %854 = vmatpush3.bf16.msra.mxu1 %v920_v17 }
  0x38   : > { %847 = vmatprep.subr.bf16.mxu1 %v921_v18 }
  0x39   : > { %826 = vmatpush3.bf16.msra.mxu0 %v920_v17 }
  0x3a   : > { %827 = vmatprep.subr.bf16.mxu0 %v921_v18 }
  0x3b   : > { %855 = vmatpush3.bf16.msra.mxu1 %v921_v18 }
  0x3c   : > { %848 = vmatprep.subr.bf16.mxu1 %v922_v19 }
  0x3d   : > { %828 = vmatpush3.bf16.msra.mxu0 %v921_v18 }
  0x3e   : > { %829 = vmatprep.subr.bf16.mxu0 %v922_v19 }
  0x3f   : > { %856 = vmatpush3.bf16.msra.mxu1 %v922_v19 }
  0x40   : > { %849 = vmatprep.subr.bf16.mxu1 %v923_v20 }
  0x41   : > { %830 = vmatpush3.bf16.msra.mxu0 %v922_v19 }
  0x42   : > { %831 = vmatprep.subr.bf16.mxu0 %v923_v20 }
  0x43   : > { %857 = vmatpush3.bf16.msra.mxu1 %v923_v20 }
  0x44   : > { %850 = vmatprep.subr.bf16.mxu1 %v924_v21 }
  0x45   : > { %832 = vmatpush3.bf16.msra.mxu0 %v923_v20 }
  0x46   : > { %833 = vmatprep.subr.bf16.mxu0 %v924_v21 }
  0x47   : > { %858 = vmatpush3.bf16.msra.mxu1 %v924_v21 }
  0x49   : > { %834 = vmatpush3.bf16.msra.mxu0 %v924_v21 }
  0xec   : > { %v813_v22 = vpop.f32.mrf.mxu0 }
  0xed   : > { %v408_v28 = vadd.f32 %v813_v22, %v773_v24 }
  0xee   : > { %v399_v23 = vpop.f32.mrf.mxu0 }
  0xef   : > { %v400_v26 = vadd.f32 %v773_v24, %v399_v23  ;;  %v432_v35 = vmax.f32 %v408_v28, 0.0 }
  0xf0   : > { %v814_v25 = vpop.f32.mrf.mxu0 }
  0xf1   : > { %v411_v27 = vadd.f32 %v814_v25, %v773_v24  ;;  %v430_v33 = vmax.f32 %v400_v26, 0.0 }
  0xf2   : > { %v402_v29 = vpop.f32.mrf.mxu0 }
  0xf3   : > { %v403_v30 = vadd.f32 %v773_v24, %v402_v29  ;;  %v433_v31 = vmax.f32 %v411_v27, 0.0 }
  0xf4   : > { %v817_v32 = vpop.f32.mrf.mxu0 }
  0xf5   : > { %v431_v34 = vmax.f32 %v403_v30, 0.0  ;;  %v439_v38 = vpack.c.bf16 %v433_v31, %v432_v35  ;;  %v424_v42 = vadd.f32 %v817_v32, %v773_v24 }
  0xf6   : > { %v415_v36 = vpop.f32.mrf.mxu0 }
  0xf7   : > { %v438_v37 = vpack.c.bf16 %v431_v34, %v430_v33  ;;  %v416_v40 = vadd.f32 %v773_v24, %v415_v36  ;;  %v436_v48 = vmax.f32 %v424_v42, 0.0 }
  0xf8   : > { %v818_v39 = vpop.f32.mrf.mxu0 }
  0xf9   : > { %v427_v41 = vadd.f32 %v818_v39, %v773_v24  ;;  %835 = vmatprep.mubr.bf16.mxu0 %v438_v37  ;;  %v434_v46 = vmax.f32 %v416_v40, 0.0 }
  0xfa   : > { %v418_v43 = vpop.f32.mrf.mxu0  ;;  %836 = vmatmul.mubr.bf16.vlgmr.msra.gmra.mxu0 %v439_v38 }
  0xfb   : > { %v419_v44 = vadd.f32 %v773_v24, %v418_v43  ;;  %v437_v45 = vmax.f32 %v427_v41, 0.0  ;;  %v623_v43 = vld [vmem:[%s1149_s17] sm:$0x1] }
  0xfd   : > { %v435_v47 = vmax.f32 %v419_v44, 0.0  ;;  %v441_v50 = vpack.c.bf16 %v437_v45, %v436_v48 }
  0xff   : > { %v440_v49 = vpack.c.bf16 %v435_v47, %v434_v46 }
 0x101   : > { %839 = vmatprep.mubr.bf16.mxu1 %v440_v49 }
 0x102   : > { %840 = vmatmul.mubr.bf16.vlgmr.msra.gmra.mxu1 %v441_v50 }
 0x1ba   : > { %v837_v52 = vpop.f32.mrf.mxu0 }
 0x1bb   : > { %v556_v1 = vadd.f32 %v837_v52, %v778_v57 }
 0x1bc   : > { %v547_v54 = vpop.f32.mrf.mxu0 }
 0x1bd   : > { %v548_v6 = vadd.f32 %v778_v57, %v547_v54  ;;  %v580_v16 = vmax.f32 %v556_v1, 0.0 }
 0x1be   : > { %v838_v56 = vpop.f32.mrf.mxu0 }
 0x1bf   : > { %v559_v59 = vadd.f32 %v838_v56, %v778_v57  ;;  %v578_v18 = vmax.f32 %v548_v6, 0.0  ;;  %v617_v28 = vsel %vm609_vm2, %v580_v16, -inf }
 0x1c0   : > { %v550_v60 = vpop.f32.mrf.mxu0 }
 0x1c1   : > { %v551_v7 = vadd.f32 %v778_v57, %v550_v60  ;;  %v581_v9 = vmax.f32 %v559_v59, 0.0  ;;  %v615_v29 = vsel %vm607_vm7, %v578_v18, -inf }
 0x1c2   : > { %v841_v61 = vpop.f32.mrf.mxu1 }
 0x1c3   : > { %v572_v0 = vadd.f32 %v841_v61, %v778_v57  ;;  %v579_v19 = vmax.f32 %v551_v7, 0.0  ;;  %v618_v22 = vsel %vm610_vm3, %v581_v9, -inf }
 0x1c4   : > { %v563_v3 = vpop.f32.mrf.mxu1 }
 0x1c5   : > { %v564_v8 = vadd.f32 %v778_v57, %v563_v3  ;;  %v584_v13 = vmax.f32 %v572_v0, 0.0  ;;  %v616_v30 = vsel %vm608_vm8, %v579_v19, -inf }
 0x1c6   : > { %v842_v11 = vpop.f32.mrf.mxu1 }
 0x1c7   : > { %v582_v14 = vmax.f32 %v564_v8, 0.0  ;;  %v575_v15 = vadd.f32 %v842_v11, %v778_v57  ;;  %v621_v23 = vsel %vm613_vm4, %v584_v13, -inf }
 0x1c8   : > { %v566_v17 = vpop.f32.mrf.mxu1  ;;  %v626_v32 = vmax.f32 %v617_v28, %v621_v23 }
 0x1c9   : > { %v585_v20 = vmax.f32 %v575_v15, 0.0  ;;  %v567_v21 = vadd.f32 %v778_v57, %v566_v17  ;;  %v619_v24 = vsel %vm611_vm5, %v582_v14, -inf }
 0x1ca   : > { %v624_v33 = vmax.f32 %v615_v29, %v619_v24 }
 0x1cb   : > { %v622_v25 = vsel %vm614_vm6, %v585_v20, -inf  ;;  %v583_v26 = vmax.f32 %v567_v21, 0.0 }
 0x1cc   : > { %v627_v27 = vmax.f32 %v618_v22, %v622_v25 }
 0x1cd   : > { %v620_v31 = vsel %vm612_vm9, %v583_v26, -inf }
 0x1ce   : > { %v625_v34 = vmax.f32 %v616_v30, %v620_v31  ;;  %v629_v35 = vmax.f32 %v626_v32, %v627_v27 }
 0x1d0   : > { %v628_v36 = vmax.f32 %v624_v33, %v625_v34 }
 0x1d2   : > { %v630_v37 = vmax.f32 %v628_v36, %v629_v35 }
 0x1d4   : > { %v631_v38 = vrot.slane %v630_v37, 4 }
 0x1d6   : > { %v632_v39 = vmax.f32 %v630_v37, %v631_v38 }
 0x1d8   : > { %v633_v40 = vrot.slane %v632_v39, 2 }
 0x1da   : > { %v634_v41 = vmax.f32 %v632_v39, %v633_v40 }
 0x1dc   : > { %v635_v42 = vrot.slane %v634_v41, 1 }
 0x1de   : > { %v636_v44 = vmax.f32 %v634_v41, %v635_v42 }
 0x1e0   : > { %v637_v45 = vmax.f32 %v623_v43, %v636_v44 }
 0x1e2   : > { %638 = vst [vmem:[%s1149_s17] sm:$0x1] %v637_v45 }
 0x1e3   : > { %950 = shalt.err (!%p947_p10)
}
 0x1e4   : > { %s951_s18 = scalar_lea.hbm %s650_s25, 16  ;;  %s955_s19 = scalar_lea.hbm %s1207_s6, 32 }
 0x1e5   : > { %p952_p11 = scmp.ne.s32.totalorder %s650_s25, %s951_s18  ;;  %p956_p1 = scmp.lt.s32.totalorder %s650_s25, %s1207_s6 }
 0x1e6   : > { %p957_p2 = scmp.lt.s32.totalorder %s955_s19, %s951_s18 }
 0x1e7   : > { %p953_p12 = pnand %p952_p11, %p1098_p9 }
 0x1e8   : > { %p958_p3 = por %p957_p2, %p956_p1 }
 0x1e9   : > { %p954_p0 = pneg %p953_p12 }
 0x1eb   : > { %p959_p4 = pnand %p958_p3, %p954_p0 }
 0x1ed   : > { %962 = shalt.err (!%p959_p4)
}
 0x1ee   : > { %860 = dma.vmem_to_hbm [thread:$0]  (%p1098_p9), %s653_s22, 16, %s650_s25, %s640_s7  }
 0x1ef PF: > { %p866_p5 = scmp.ge.s32.totalorder %s1015_s30, 2  ;;  %s664_s15 = sand.u32 1, %s995_s26  }
 0x1f0   : > { %s665_s23 = scalar_lea.sflag [#allocation5], %s664_s15 }
 0x1f1   : > { %p863_p6 = pnand %p866_p5, %p1105_p13 }
 0x1f3   : > { %p864_p7 = pneg %p863_p6 }
 0x1f5   : > { %990 = dma.done.wait (%p864_p7), %s665_s23, 16  }
 0x1f6   : > { %992 = vsyncadd (%p864_p7), %s665_s23, 4294967280  ;;  %s25_s30 = sadd.s32 1, %s1015_s30   ;;  %s1210_s26 = smov %s999_s27 }
 0x1f7   : > { %p22_p8 = scmp.ge.s32.totalorder %s25_s30, 4   ;;  %s1211_s27 = smov %s1003_s0 }
 0x1f8   : > { %s1212_s0 = smov %s1111_s14  ;;  %s1213_s28 = smov %s1011_s29 }
 0x1f9   : > { %s1214_s29 = smov %s1216_s9  ;;  %24 = sbr.rel (!%p22_p8) target bundleno = 19 (0x13), region = 91 }
 0x1fe   :  { %669 = vsyncpa [#allocation5], 1 }
 0x1ff   :  { %671 = vsyncpa [#allocation5 + $0x1], 1 }

</bundles_post_ra>
